<compile_context>
chip_gen: v5e
topology: v5e:2x2
jax: 0.10.0
libtpu: 0.0.40
codegen_flags: <defaults>
</compile_context>

<pallas_src>
import functools

import jax
import jax.numpy as jnp
from jax.experimental import pallas as pl
from jax.experimental.pallas import tpu as pltpu


def ffn_swiglu_kernel(x_ref, w_up_ref, b_up_ref, w_out_ref, b_out_ref,
                      o_ref, *scratch, tn):
    k = pl.program_id(1)
    # If no scratch was allocated the (f32) output block itself is the
    # accumulator (it is resident across k: its block index only depends on i).
    acc_ref = scratch[0] if scratch else o_ref

    x = x_ref[...]                       # (tm, dim)     bf16 (pre-cast)
    w_up = w_up_ref[...]                 # (dim, 2*tn)   bf16 (pre-cast)

    # Fused up-projection: one MXU matmul yields [h | g] for this hidden tile.
    hg = jnp.dot(x, w_up, preferred_element_type=jnp.float32) + b_up_ref[...]
    h = hg[:, :tn]
    g = hg[:, tn:]
    z = h * (g * jax.nn.sigmoid(g))      # SwiGLU gate, f32

    # Down-projection contribution of this hidden tile (f32 accumulation).
    contrib = jnp.dot(z.astype(w_out_ref.dtype), w_out_ref[...],
                      preferred_element_type=jnp.float32)

    @pl.when(k == 0)
    def _():
        acc_ref[...] = contrib.astype(acc_ref.dtype)

    @pl.when(k > 0)
    def _():
        acc_ref[...] += contrib.astype(acc_ref.dtype)

    @pl.when(k == pl.num_programs(1) - 1)
    def _():
        o_ref[...] = (acc_ref[...].astype(jnp.float32)
                      + b_out_ref[...]).astype(o_ref.dtype)


def prepare_ffn_swiglu_params(w_fc, b_fc, w_act, b_act, w_out, b_out, *,
                              tn=256, compute_dtype=jnp.bfloat16):
    """One-time parameter prep (do this at load time, NOT per forward call).

    w_fc/w_act: (dim, hidden), w_out: (hidden, dim), b_*: (hidden,)/(dim,).
    Returns bf16 fused up-projection weights tiled over the hidden dim, f32
    biases, bf16 down-projection weights, and the chosen hidden tile size tn.
    """
    dim, hidden = w_fc.shape
    tn = min(tn, hidden)
    assert dim % 128 == 0, "dim must be a multiple of 128 (lane axis)"
    assert tn % 128 == 0 and hidden % tn == 0, \
        "hidden tile must be a multiple of 128 and divide hidden"
    n_h = hidden // tn

    # (n_h, dim, 2*tn) with columns [fc | act] per hidden tile.
    w_up = jnp.concatenate(
        [w_fc.reshape(dim, n_h, tn), w_act.reshape(dim, n_h, tn)], axis=-1)
    w_up = jnp.transpose(w_up, (1, 0, 2)).astype(compute_dtype)
    b_up = jnp.concatenate(
        [b_fc.reshape(n_h, 1, tn), b_act.reshape(n_h, 1, tn)],
        axis=-1).astype(jnp.float32)                                  # (n_h,1,2tn)
    w_out_p = w_out.astype(compute_dtype)                             # (hidden,dim)
    b_out_p = b_out.reshape(1, dim).astype(jnp.float32)               # (1, dim)
    return w_up, b_up, w_out_p, b_out_p, tn


def ffn_swiglu(x, w_up, b_up, w_out, b_out, tn, *,
               tm=256, compute_dtype=jnp.bfloat16):
    """x: (M, dim).  Params from prepare_ffn_swiglu_params."""
    M, dim = x.shape
    n_h = w_up.shape[0]
    hidden = n_h * tn
    out_dtype = x.dtype

    # Row tile: as large as requested but no bigger than M rounded up to the
    # bf16 sublane pack (16).
    tm = min(tm, ((M + 15) // 16) * 16)
    m_pad = pl.cdiv(M, tm) * tm
    x = x.astype(compute_dtype)          # pre-cast once; kernel does no casts on x
    if m_pad != M:
        x = jnp.pad(x, ((0, m_pad - M), (0, 0)))   # zero tail rows, clipped below

    grid_m = m_pad // tm
    grid = (grid_m, n_h)
    # TODO(synk): on v7x, when grid_m < 2 add a second "parallel" axis over the
    # output dim so both TensorCores get work for decode-sized M.

    # Accumulate directly into the output block when it is already f32;
    # otherwise keep a resident f32 VMEM scratch accumulator.
    use_scratch = (jnp.dtype(out_dtype) != jnp.dtype(jnp.float32))
    scratch_shapes = ([pltpu.VMEM((tm, dim), jnp.float32)] if use_scratch else [])

    # VMEM budget from the actual tile footprint (2x for double buffering).
    c_sz = jnp.dtype(compute_dtype).itemsize
    o_sz = jnp.dtype(out_dtype).itemsize
    blk_bytes = (tm * dim * c_sz            # x block
                 + dim * 2 * tn * c_sz      # fused up-weight block
                 + 2 * tn * 4               # fused up-bias block
                 + tn * dim * c_sz          # down-weight block
                 + dim * 4                  # down-bias block
                 + tm * dim * o_sz)         # output block
    acc_bytes = tm * dim * 4 if use_scratch else 0
    vmem_limit = int(2 * blk_bytes * 1.25) + acc_bytes + (2 << 20)
    vmem_limit = min(max(vmem_limit, 8 << 20), 100 << 20)

    flops = 6 * m_pad * dim * hidden        # 2*M*dim*2H (up) + 2*M*H*dim (down)
    # Weights are re-streamed once per row tile (their index_map ignores i).
    weight_bytes = (w_up.size * w_up.dtype.itemsize
                    + b_up.size * b_up.dtype.itemsize
                    + w_out.size * w_out.dtype.itemsize
                    + b_out.size * b_out.dtype.itemsize)
    bytes_accessed = int(m_pad * dim * c_sz
                         + grid_m * weight_bytes
                         + m_pad * dim * o_sz)

    out = pl.pallas_call(
        functools.partial(ffn_swiglu_kernel, tn=tn),
        out_shape=jax.ShapeDtypeStruct((m_pad, dim), out_dtype),
        grid_spec=pltpu.PrefetchScalarGridSpec(
            num_scalar_prefetch=0,
            grid=grid,
            in_specs=[
                pl.BlockSpec((tm, dim), lambda i, k: (i, 0)),               # x rows
                pl.BlockSpec((None, dim, 2 * tn), lambda i, k: (k, 0, 0)),  # up weights
                pl.BlockSpec((None, 1, 2 * tn), lambda i, k: (k, 0, 0)),    # up biases
                pl.BlockSpec((tn, dim), lambda i, k: (k, 0)),               # down weights
                pl.BlockSpec((1, dim), lambda i, k: (0, 0)),                # down bias
            ],
            out_specs=pl.BlockSpec((tm, dim), lambda i, k: (i, 0)),
            scratch_shapes=scratch_shapes,
        ),
        compiler_params=pltpu.CompilerParams(
            dimension_semantics=("parallel", "arbitrary"),
            vmem_limit_bytes=vmem_limit,
        ),
        cost_estimate=pl.CostEstimate(
            flops=flops,
            transcendentals=m_pad * hidden,
            bytes_accessed=bytes_accessed),
    )(x, w_up, b_up, w_out, b_out)
    return out[:M]


def init_linear(key, in_dim, out_dim, dtype):
    # PyTorch nn.Linear default init: U(-1/sqrt(in), 1/sqrt(in)) for W and b.
    kw, kb = jax.random.split(key)
    bound = 1.0 / jnp.sqrt(in_dim)
    w = jax.random.uniform(kw, (out_dim, in_dim), dtype, -bound, bound)
    b = jax.random.uniform(kb, (out_dim,), dtype, -bound, bound)
    return w, b


if __name__ == "__main__":
    dtype = jnp.float32
    # Small but lane-dense shapes: dim and hidden are multiples of 128.
    batch, seq, dim, hidden = 2, 16, 128, 512

    key = jax.random.PRNGKey(0)
    kx, k1, k2, k3 = jax.random.split(key, 4)

    x = jax.random.normal(kx, (batch, seq, dim), dtype)

    # Deterministic parameter init matching nn.Linear shapes.
    w_fc_t, b_fc = init_linear(k1, dim, hidden, dtype)      # fc:     (hidden, dim)
    w_act_t, b_act = init_linear(k2, dim, hidden, dtype)    # fc_act: (hidden, dim)
    w_out_t, b_out = init_linear(k3, hidden, dim, dtype)    # fc_out: (dim, hidden)

    # Transpose to (in, out) so the kernel computes x @ W.
    w_fc = w_fc_t.T      # (dim, hidden)
    w_act = w_act_t.T    # (dim, hidden)
    w_out = w_out_t.T    # (hidden, dim)

    # One-time parameter prep (fusion + bf16 cast), outside the per-call path.
    w_up, b_up, w_out_p, b_out_p, tn = prepare_ffn_swiglu_params(
        w_fc, b_fc, w_act, b_act, w_out, b_out, tn=256)

    x_flat = x.reshape(batch * seq, dim)
    out_flat = ffn_swiglu(x_flat, w_up, b_up, w_out_p, b_out_p, tn, tm=256)
    out = out_flat.reshape(batch, seq, dim)
    jax.block_until_ready(out)

    # Reference in plain f32 JAX (same math as the PyTorch module). The kernel
    # runs the matmuls with bf16 operands + f32 accumulation, so the tolerance
    # is relaxed accordingly.
    h_ref = x_flat @ w_fc + b_fc
    g_ref = x_flat @ w_act + b_act
    z_ref = h_ref * (g_ref * jax.nn.sigmoid(g_ref))
    ref = (z_ref @ w_out + b_out).reshape(batch, seq, dim)
    assert jnp.allclose(out, ref, atol=2e-2, rtol=2e-2), "mismatch vs reference"

    print("KERNEL_OK")
</pallas_src>

<mosaic_0001>
module attributes {stable_mosaic.version = 11 : i64} {
  func.func @ffn_swiglu_kernel(%arg0: i32, %arg1: i32, %arg2: memref<32x128xbf16, #tpu.memory_space<vmem>>, %arg3: memref<1x128x512xbf16, #tpu.memory_space<vmem>>, %arg4: memref<1x1x512xf32, #tpu.memory_space<vmem>>, %arg5: memref<256x128xbf16, #tpu.memory_space<vmem>>, %arg6: memref<1x128xf32, #tpu.memory_space<vmem>>, %arg7: memref<32x128xf32, #tpu.memory_space<vmem>>) attributes {dimension_semantics = [#tpu.dimension_semantics<parallel>, #tpu.dimension_semantics<arbitrary>], iteration_bounds = array<i64: 1, 2>, scalar_prefetch = 0 : i64, scratch_operands = 0 : i64, tpu.core_type = #tpu.core_type<tc>, window_params = [{transform_indices = @transform_0, window_bounds = array<i64: 32, 128>}, {transform_indices = @transform_1, window_bounds = array<i64: 1, 128, 512>}, {transform_indices = @transform_2, window_bounds = array<i64: 1, 1, 512>}, {transform_indices = @transform_3, window_bounds = array<i64: 256, 128>}, {pipeline_mode = #tpu.pipeline_mode<synchronous>, transform_indices = @transform_4, window_bounds = array<i64: 1, 128>}, {transform_indices = @transform_5, window_bounds = array<i64: 32, 128>}]} {
    %c0 = arith.constant 0 : index
    %c0_0 = arith.constant 0 : index
    %0 = vector.load %arg2[%c0, %c0_0] : memref<32x128xbf16, #tpu.memory_space<vmem>>, vector<32x128xbf16>
    %c0_1 = arith.constant 0 : index
    %c0_2 = arith.constant 0 : index
    %c0_3 = arith.constant 0 : index
    %1 = vector.load %arg3[%c0_1, %c0_2, %c0_3] : memref<1x128x512xbf16, #tpu.memory_space<vmem>>, vector<1x128x512xbf16>
    %2 = vector.shape_cast %1 : vector<1x128x512xbf16> to vector<128x512xbf16>
    %cst = arith.constant dense<0.000000e+00> : vector<32x512xf32>
    %3 = tpu.matmul %0, %2, %cst {dimension_numbers = #tpu.dot_dimension_numbers<[1], [0], [0], [1], [0, 0, 1, 1], [], []>} : vector<32x128xbf16>, vector<128x512xbf16>, vector<32x512xf32> -> vector<32x512xf32>
    %c0_4 = arith.constant 0 : index
    %c0_5 = arith.constant 0 : index
    %c0_6 = arith.constant 0 : index
    %4 = vector.load %arg4[%c0_4, %c0_5, %c0_6] : memref<1x1x512xf32, #tpu.memory_space<vmem>>, vector<1x1x512xf32>
    %5 = vector.shape_cast %4 : vector<1x1x512xf32> to vector<1x512xf32>
    %6 = vector.broadcast %5 : vector<1x512xf32> to vector<32x512xf32>
    %7 = arith.addf %3, %6 : vector<32x512xf32>
    %8 = vector.extract_strided_slice %7 {offsets = [0, 0], sizes = [32, 256], strides = [1, 1]} : vector<32x512xf32> to vector<32x256xf32>
    %9 = vector.extract_strided_slice %7 {offsets = [0, 256], sizes = [32, 256], strides = [1, 1]} : vector<32x512xf32> to vector<32x256xf32>
    %10 = arith.negf %9 : vector<32x256xf32>
    %11 = math.exp %10 : vector<32x256xf32>
    %cst_7 = arith.constant 1.000000e+00 : f32
    %12 = vector.broadcast %cst_7 : f32 to vector<32x256xf32>
    %13 = arith.addf %12, %11 : vector<32x256xf32>
    %14 = arith.divf %12, %13 : vector<32x256xf32>
    %15 = arith.mulf %9, %14 : vector<32x256xf32>
    %16 = arith.mulf %8, %15 : vector<32x256xf32>
    %17 = arith.truncf %16 : vector<32x256xf32> to vector<32x256xbf16>
    %c0_8 = arith.constant 0 : index
    %c0_9 = arith.constant 0 : index
    %18 = vector.load %arg5[%c0_8, %c0_9] : memref<256x128xbf16, #tpu.memory_space<vmem>>, vector<256x128xbf16>
    %cst_10 = arith.constant dense<0.000000e+00> : vector<32x128xf32>
    %19 = tpu.matmul %17, %18, %cst_10 {dimension_numbers = #tpu.dot_dimension_numbers<[1], [0], [0], [1], [0, 0, 1, 1], [], []>} : vector<32x256xbf16>, vector<256x128xbf16>, vector<32x128xf32> -> vector<32x128xf32>
    %c0_i32 = arith.constant 0 : i32
    %20 = arith.cmpi eq, %arg1, %c0_i32 : i32
    %21 = arith.extui %20 : i1 to i32
    %c0_i32_11 = arith.constant 0 : i32
    %22 = arith.cmpi ne, %21, %c0_i32_11 : i32
    scf.if %22 {
      %c0_15 = arith.constant 0 : index
      %c0_16 = arith.constant 0 : index
      %29 = vector.load %arg7[%c0_15, %c0_16] : memref<32x128xf32, #tpu.memory_space<vmem>>, vector<32x128xf32>
      tpu.vector_store %arg7[%c0_15, %c0_16], %19 {strides = array<i32>} : memref<32x128xf32, #tpu.memory_space<vmem>>, vector<32x128xf32>,
    } else {
    }
    %c0_i32_12 = arith.constant 0 : i32
    %23 = arith.cmpi sgt, %arg1, %c0_i32_12 : i32
    %24 = arith.extui %23 : i1 to i32
    %c0_i32_13 = arith.constant 0 : i32
    %25 = arith.cmpi ne, %24, %c0_i32_13 : i32
    scf.if %25 {
      %c0_15 = arith.constant 0 : index
      %c0_16 = arith.constant 0 : index
      %29 = vector.load %arg7[%c0_15, %c0_16] : memref<32x128xf32, #tpu.memory_space<vmem>>, vector<32x128xf32>
      %30 = arith.addf %29, %19 : vector<32x128xf32>
      %c0_17 = arith.constant 0 : index
      %c0_18 = arith.constant 0 : index
      %31 = vector.load %arg7[%c0_17, %c0_18] : memref<32x128xf32, #tpu.memory_space<vmem>>, vector<32x128xf32>
      tpu.vector_store %arg7[%c0_17, %c0_18], %30 {strides = array<i32>} : memref<32x128xf32, #tpu.memory_space<vmem>>, vector<32x128xf32>,
    } else {
    }
    %c1_i32 = arith.constant 1 : i32
    %26 = arith.cmpi eq, %arg1, %c1_i32 : i32
    %27 = arith.extui %26 : i1 to i32
    %c0_i32_14 = arith.constant 0 : i32
    %28 = arith.cmpi ne, %27, %c0_i32_14 : i32
    scf.if %28 {
      %c0_15 = arith.constant 0 : index
      %c0_16 = arith.constant 0 : index
      %29 = vector.load %arg7[%c0_15, %c0_16] : memref<32x128xf32, #tpu.memory_space<vmem>>, vector<32x128xf32>
      %c0_17 = arith.constant 0 : index
      %c0_18 = arith.constant 0 : index
      %30 = vector.load %arg6[%c0_17, %c0_18] : memref<1x128xf32, #tpu.memory_space<vmem>>, vector<1x128xf32>
      %31 = vector.broadcast %30 : vector<1x128xf32> to vector<32x128xf32>
      %32 = arith.addf %29, %31 : vector<32x128xf32>
      %c0_19 = arith.constant 0 : index
      %c0_20 = arith.constant 0 : index
      %33 = vector.load %arg7[%c0_19, %c0_20] : memref<32x128xf32, #tpu.memory_space<vmem>>, vector<32x128xf32>
      tpu.vector_store %arg7[%c0_19, %c0_20], %32 {strides = array<i32>} : memref<32x128xf32, #tpu.memory_space<vmem>>, vector<32x128xf32>,
    } else {
    }
    return
  }
  func.func @transform_0(%arg0: i32, %arg1: i32) -> (i32, i32) {
    %c0_i32 = arith.constant 0 : i32
    %c0_i32_0 = arith.constant 0 : i32
    return %arg0, %c0_i32 : i32, i32
  }
  func.func @transform_1(%arg0: i32, %arg1: i32) -> (i32, i32, i32) {
    %c0_i32 = arith.constant 0 : i32
    %c0_i32_0 = arith.constant 0 : i32
    %c0_i32_1 = arith.constant 0 : i32
    return %arg1, %c0_i32, %c0_i32_0 : i32, i32, i32
  }
  func.func @transform_2(%arg0: i32, %arg1: i32) -> (i32, i32, i32) {
    %c0_i32 = arith.constant 0 : i32
    %c0_i32_0 = arith.constant 0 : i32
    %c0_i32_1 = arith.constant 0 : i32
    return %arg1, %c0_i32, %c0_i32_0 : i32, i32, i32
  }
  func.func @transform_3(%arg0: i32, %arg1: i32) -> (i32, i32) {
    %c0_i32 = arith.constant 0 : i32
    %c0_i32_0 = arith.constant 0 : i32
    return %arg1, %c0_i32 : i32, i32
  }
  func.func @transform_4(%arg0: i32, %arg1: i32) -> (i32, i32) {
    %c0_i32 = arith.constant 0 : i32
    %c0_i32_0 = arith.constant 0 : i32
    %c0_i32_1 = arith.constant 0 : i32
    return %c0_i32, %c0_i32_0 : i32, i32
  }
  func.func @transform_5(%arg0: i32, %arg1: i32) -> (i32, i32) {
    %c0_i32 = arith.constant 0 : i32
    %c0_i32_0 = arith.constant 0 : i32
    return %arg0, %c0_i32 : i32, i32
  }
}

</mosaic_0001>

<bundles_post_ra>
// kernel: tpu_custom_call.1
= control target key start
LH: loop header
LB: loop body
LE: loop exit
PB: predicated region body
PF: predicated region fallthrough
CT: control target
= control target key end

     0   :  { %s2265_s0 = inlined_call_operand.hbm [shape: bf16[32,128], index: 0, kind: input, shape index: {}]   ;;  %s2266_s1 = inlined_call_operand.hbm [shape: bf16[2,128,512], index: 1, kind: input, shape index: {}]   ;;  %s2267_s2 = inlined_call_operand.hbm [shape: f32[2,1,512], index: 2, kind: input, shape index: {}]   ;;  %s2268_s3 = inlined_call_operand.hbm [shape: bf16[512,128], index: 3, kind: input, shape index: {}]   ;;  %s2269_s4 = inlined_call_operand.vmem [shape: f32[1,128], index: 4, kind: input, shape index: {}]   ;;  %s2270_s5 = inlined_call_operand.hbm [shape: f32[32,128], index: 5, kind: output, shape index: {}]  }
   0x1   :  { %2274 = sst [smem:[#allocation19_spill]] %s2265_s0 }
   0x2   :  { %2275 = sst [smem:[#allocation20_spill]] %s2266_s1 }
   0x3   :  { %10 = vsyncpa [#allocation3], 0 }
   0x4   :  { %11 = vsyncpa [#allocation6], 0 }
   0x5   :  { %13 = vsyncpa [#allocation6 + $0x1], 0 }
   0x6   :  { %14 = vsyncpa [#allocation9], 0 }
   0x7   :  { %16 = vsyncpa [#allocation9 + $0x1], 0 }
   0x8   :  { %17 = vsyncpa [#allocation4], 0  ;;  %s1836_s18 = smov 0   ;;  %s1838_s19 = smov 0  }
   0x9   :  { %s1840_s20 = smov 0   ;;  %s1842_s21 = smov 0  }
   0xa   :  { %s1844_s22 = smov 0   ;;  %s1846_s23 = smov 0  }
   0xb LB: > { %2276 = sst [smem:[#allocation15_spill]] %s1784_s20  ;;  %s32_s24 = sadd.s32 1, %s1792_s22  ;;  %s1796_s23 = sphi %s1846_s23, %s23_s23   ;;  %s1792_s22 = sphi %s1844_s22, %s2307_s22   ;;  %s1788_s21 = sphi %s1842_s21, %s2306_s21   ;;  %s1784_s20 = sphi %s1840_s20, %s2302_s20   ;;  %s1780_s19 = sphi %s1838_s19, %s2305_s19   ;;  %s1776_s18 = sphi %s1836_s18, %s2304_s18  }
   0xc   : > { %2277 = sst [smem:[#allocation16_spill]] %s1796_s23  ;;  %s68_s25 = sadd.s32 1, %s1784_s20 }
   0xd   : > { %p33_p0 = scmp.ge.s32.totalorder %s32_s24, 2  ;;  %p75_p1 = scmp.ne.s32.totalorder %s1784_s20, %s1780_s19 }
   0xe   : > { %p76_p2 = scmp.eq.s32.totalorder %s1796_s23, 0  ;;  %p1493_p4 = scmp.lt.s32.totalorder %s1796_s23, 2 }
   0xf   : > { %s2309_s24 = smov (%p33_p0, %s32_s24), 0  ;;  %s224_s28 = sand.u32 1, %s1796_s23  }
  0x10   : > { %2278 = sst [smem:[#allocation17_spill]] %s2309_s24  ;;  %p1873_p3 = por %p76_p2, %p75_p1 }
  0x11   : > { %s65_s27 = ssub.s32 %s1792_s22, %s2309_s24  ;;  %s1882_s29 = sand.u32 1, %s1784_s20  }
  0x12   : > { %p66_p5 = scmp.eq.s32.totalorder %s65_s27, 0  ;;  %s1396_s30 = sshll.u32 %s1792_s22, 8 }
  0x13   : > { %s1168_s7 = sshll.u32 %s1882_s29, 8  ;;  %s2281_s1 = sld [smem:[#allocation20_spill]] }
  0x14   : > { %s1886_s6 = scalar_select %p66_p5, %s1784_s20, %s68_s25  }
  0x15   : > { %s228_s12 = scalar_lea.vmem [#allocation5], %s1168_s7  ;;  %p1896_p6 = pnand %p1493_p4, %p1873_p3 }
  0x16   : > { %2280 = sst [smem:[#allocation18_spill]] %s1886_s6  ;;  %s236_s13 = sshll.u32 %s228_s12, 4  ;;  %s237_s13 = int_to_ptr.vmem [resolvable:$true] %s236_s13 }
  0x17   : > { %s1900_s15 = scalar_lea.sflag [#allocation6], %s224_s28  ;;  %s1798_s16 = smov 256  }
  0x18   : > { %s1799_s17 = smov 16   ;;  %s1906_s25 = sadd.s32 4294967295, %s1796_s23  }
  0x19   : > { %s233_s10 = scalar_lea.hbm %s2281_s1, %s1396_s30  ;;  %p81_p7 = scmp.ne.s32.totalorder %s1780_s19, %s1776_s18 }
  0x1a   : > { %s234_s11 = sshll.u32 %s233_s10, 4  ;;  %p82_p8 = scmp.eq.s32.totalorder %s1906_s25, 0  ;;  %s235_s11 = int_to_ptr.hbm [resolvable:$true] %s234_s11 }
  0x1b   : > { %1485 = dma.hbm_to_vmem [thread:$0]  (!%p1896_p6), %s235_s11, 4096, %s237_s13, %s1900_s15, %s1798_s16, %s1798_s16, %s1799_s17  }
  0x1c   : > { %p1165_p9 = scmp.ge.s32.totalorder %s1796_s23, 1  ;;  %p191_p10 = scmp.lt.s32.totalorder %s1796_s23, 3 }
  0x1d   : > { %p1915_p11 = por %p82_p8, %p81_p7  ;;  %s2285_s0 = sld [smem:[#allocation19_spill]] }
  0x1e   : > { %p1919_p12 = pnand %p1165_p9, %p191_p10  ;;  %s1800_s18 = smov [#allocation2]  }
  0x1f   : > { %s207_s8 = sshll.u32 %s1800_s18, 4  ;;  %s1171_s9 = sshll.u32 %s1882_s29, 2  ;;  %s208_s8 = int_to_ptr.vmem [resolvable:$true] %s207_s8 }
  0x20   : > { %p1478_p13 = pneg %p1919_p12  ;;  %s1172_s10 = sshll.u32 %s1792_s22, 2 }
  0x21   : > { %s1801_s11 = smov 64   ;;  %s1802_s12 = smov 4  }
  0x22   : > { %p1479_p0 = pnand %p1478_p13, %p82_p8  ;;  %s254_s17 = scalar_lea.hbm %s2267_s2, %s1172_s10 }
  0x23   : > { %s205_s7 = sshll.u32 %s2285_s0, 4  ;;  %s250_s28 = scalar_lea.vmem [#allocation7], %s1171_s9  ;;  %s206_s7 = int_to_ptr.hbm [resolvable:$true] %s205_s7 }
  0x24   : > { %1481 = dma.hbm_to_vmem [thread:$0]  (!%p1479_p0), %s206_s7, 256, %s208_s8, [#allocation3], %s1801_s11, %s1801_s11, %s1802_s12  }
  0x25   : > { %s258_s30 = sshll.u32 %s250_s28, 4  ;;  %s256_s0 = sshll.u32 %s254_s17, 4  ;;  %s259_s30 = int_to_ptr.vmem [resolvable:$true] %s258_s30  ;;  %s257_s0 = int_to_ptr.hbm [resolvable:$true] %s256_s0 }
  0x26   : > { %1488 = dma.hbm_to_vmem [thread:$0]  (!%p1896_p6), %s257_s0, 64, %s259_s30, %s1900_s15  }
  0x27   : > { %s1173_s18 = sshll.u32 %s1882_s29, 7  ;;  %s1397_s1 = sshll.u32 %s1792_s22, 7 }
  0x28   : > { %s274_s20 = scalar_lea.hbm %s2268_s3, %s1397_s1  ;;  %s269_s8 = scalar_lea.vmem [#allocation8], %s1173_s18 }
  0x29   : > { %s275_s7 = sshll.u32 %s274_s20, 4  ;;  %s277_s23 = sshll.u32 %s269_s8, 4  ;;  %s276_s7 = int_to_ptr.hbm [resolvable:$true] %s275_s7  ;;  %s278_s23 = int_to_ptr.vmem [resolvable:$true] %s277_s23 }
  0x2a   : > { %s266_s10 = scalar_lea.sflag [#allocation9], %s1882_s29  ;;  %289 = sbr.rel (%p1919_p12) target bundleno = 465 (0x1d1), region = 40 }
  0x2b   : > { %1491 = dma.hbm_to_vmem [thread:$0]  (!%p1896_p6), %s276_s7, 2048, %s278_s23, %s266_s10, %s1801_s11, %s1801_s11, %s1802_s12  }
  0x2f   : > { %1759 = dma.done.wait (%p82_p8), [#allocation3], 256  }
  0x30   : > { %1761 = vsyncadd (%p82_p8), [#allocation3], 4294967040  ;;  %s296_s0 = sand.u32 1, %s1906_s25   ;;  %s298_s1 = sand.u32 1, %s1780_s19  }
  0x31   : > { %s1178_s20 = sshll.u32 %s298_s1, 8  ;;  %s297_s24 = scalar_lea.sflag [#allocation6], %s296_s0 }
  0x32   : > { %s1954_s6 = scalar_lea.vmem [#allocation5], %s1178_s20 }
  0x33   : > { %1763 = dma.done.wait (%p1915_p11), %s297_s24, 4160  }
  0x34   : > { %1765 = vsyncadd (%p1915_p11), %s297_s24, 4294963136  ;;  %s1179_s23 = sshll.u32 %s298_s1, 2  ;;  %s1180_s29 = sshll.u32 %s298_s1, 7 }
  0x35   : > { %s1960_s14 = scalar_lea.vmem [#allocation7], %s1179_s23  ;;  %s317_s15 = scalar_lea.sflag [#allocation9], %s298_s1 }
  0x36   : > { %s1962_s27 = scalar_lea.vmem [#allocation8], %s1180_s29 }
  0x37   : > { %1767 = dma.done.wait (%p1915_p11), %s317_s15, 2048  }
  0x38   : > { %1769 = vsyncadd (%p1915_p11), %s317_s15, 4294965248  ;;  %v1311_v0 = vld [vmem:[%s1954_s6 + $0xe8] sm:$0xf]  ;;  %v1431_v1 = vld [vmem:[%s1954_s6 + $0xf4] sm:$0xf0]  ;;  %p1389_p1 = scmp.ne.s32.totalorder %s1788_s21, 0 }
  0x39   : > { %v1429_v2 = vld [vmem:[%s1954_s6 + $0xec] sm:$0xf]  ;;  %v1312_v3 = vor.u32 %v1431_v1, %v1311_v0  ;;  %v1313_v4 = vld [vmem:[%s1954_s6 + $0xf8] sm:$0xf0]  ;;  %v1295_v5 = vld [vmem:[%s1954_s6 + $0xc8] sm:$0xf] }
  0x3a   : > { %v1427_v6 = vld [vmem:[%s1954_s6 + $0xd4] sm:$0xf0]  ;;  %v1316_v7 = vor.u32 %v1429_v2, %v1313_v4  ;;  %v1425_v8 = vld [vmem:[%s1954_s6 + $0xcc] sm:$0xf]  ;;  %v1297_v9 = vld [vmem:[%s1954_s6 + $0xd8] sm:$0xf0] }
  0x3b   : > { %612 = vmatpush.bf16.msra.mxu2 %v1312_v3  ;;  %v1296_v10 = vor.u32 %v1427_v6, %v1295_v5  ;;  %v1300_v11 = vor.u32 %v1425_v8, %v1297_v9  ;;  %v1279_v12 = vld [vmem:[%s1954_s6 + $0xa8] sm:$0xf]  ;;  %v1423_v13 = vld [vmem:[%s1954_s6 + $0xb4] sm:$0xf0]  ;;  %v1421_v14 = vld [vmem:[%s1954_s6 + $0xac] sm:$0xf] }
  0x3c   : > { %631 = vmatpush.bf16.msra.mxu3 %v1316_v7  ;;  %v1281_v15 = vld [vmem:[%s1954_s6 + $0xb8] sm:$0xf0]  ;;  %v1280_v16 = vor.u32 %v1423_v13, %v1279_v12  ;;  %v1263_v18 = vld [vmem:[%s1954_s6 + $0x88] sm:$0xf]  ;;  %v1419_v19 = vld [vmem:[%s1954_s6 + $0x94] sm:$0xf0] }
  0x3d   : > { %v1284_v17 = vor.u32 %v1421_v14, %v1281_v15  ;;  %v1417_v20 = vld [vmem:[%s1954_s6 + $0x8c] sm:$0xf]  ;;  %v1265_v21 = vld [vmem:[%s1954_s6 + $0x98] sm:$0xf0]  ;;  %v1303_v22 = vld [vmem:[%s1954_s6 + $0xe0] sm:$0xf]  ;;  %v1264_v27 = vor.u32 %v1419_v19, %v1263_v18 }
  0x3e   : > { %v1430_v23 = vld [vmem:[%s1954_s6 + $0xec] sm:$0xf0]  ;;  %v1428_v25 = vld [vmem:[%s1954_s6 + $0xe4] sm:$0xf]  ;;  %v1305_v26 = vld [vmem:[%s1954_s6 + $0xf0] sm:$0xf0]  ;;  %v1268_v32 = vor.u32 %v1417_v20, %v1265_v21 }
  0x3f   : > { %613 = vmatpush.bf16.msra.mxu2 %v1296_v10  ;;  %v1304_v24 = vor.u32 %v1430_v23, %v1303_v22  ;;  %v1247_v28 = vld [vmem:[%s1954_s6 + $0x68] sm:$0xf]  ;;  %v1415_v29 = vld [vmem:[%s1954_s6 + $0x74] sm:$0xf0]  ;;  %v1413_v30 = vld [vmem:[%s1954_s6 + $0x6c] sm:$0xf]  ;;  %v1308_v31 = vor.u32 %v1428_v25, %v1305_v26 }
  0x40   : > { %632 = vmatpush.bf16.msra.mxu3 %v1300_v11  ;;  %v1249_v33 = vld [vmem:[%s1954_s6 + $0x78] sm:$0xf0]  ;;  %v1287_v34 = vld [vmem:[%s1954_s6 + $0xc0] sm:$0xf]  ;;  %v1426_v35 = vld [vmem:[%s1954_s6 + $0xcc] sm:$0xf0]  ;;  %v1248_v44 = vor.u32 %v1415_v29, %v1247_v28 }
  0x41   : > { %574 = vmatpush.bf16.msra.mxu0 %v1304_v24  ;;  %593 = vmatpush.bf16.msra.mxu1 %v1308_v31  ;;  %v1288_v36 = vor.u32 %v1426_v35, %v1287_v34  ;;  %v1424_v37 = vld [vmem:[%s1954_s6 + $0xc4] sm:$0xf]  ;;  %v1289_v38 = vld [vmem:[%s1954_s6 + $0xd0] sm:$0xf0]  ;;  %v1271_v39 = vld [vmem:[%s1954_s6 + $0xa0] sm:$0xf]  ;;  %v1252_v45 = vor.u32 %v1413_v30, %v1249_v33 }
  0x42   : > { %v1292_v40 = vor.u32 %v1424_v37, %v1289_v38  ;;  %v1422_v41 = vld [vmem:[%s1954_s6 + $0xac] sm:$0xf0]  ;;  %v1420_v42 = vld [vmem:[%s1954_s6 + $0xa4] sm:$0xf]  ;;  %v1273_v43 = vld [vmem:[%s1954_s6 + $0xb0] sm:$0xf0] }
  0x43   : > { %614 = vmatpush.bf16.msra.mxu2 %v1280_v16  ;;  %v1231_v46 = vld [vmem:[%s1954_s6 + $0x48] sm:$0xf]  ;;  %v1411_v47 = vld [vmem:[%s1954_s6 + $0x54] sm:$0xf0]  ;;  %v1409_v48 = vld [vmem:[%s1954_s6 + $0x4c] sm:$0xf]  ;;  %v1272_v49 = vor.u32 %v1422_v41, %v1271_v39  ;;  %v1276_v51 = vor.u32 %v1420_v42, %v1273_v43 }
  0x44   : > { %633 = vmatpush.bf16.msra.mxu3 %v1284_v17  ;;  %v1233_v50 = vld [vmem:[%s1954_s6 + $0x58] sm:$0xf0]  ;;  %v1255_v52 = vld [vmem:[%s1954_s6 + $0x80] sm:$0xf]  ;;  %v1418_v53 = vld [vmem:[%s1954_s6 + $0x8c] sm:$0xf0]  ;;  %v1232_v56 = vor.u32 %v1411_v47, %v1231_v46 }
  0x45   : > { %575 = vmatpush.bf16.msra.mxu0 %v1288_v36  ;;  %594 = vmatpush.bf16.msra.mxu1 %v1292_v40  ;;  %v1416_v54 = vld [vmem:[%s1954_s6 + $0x84] sm:$0xf]  ;;  %v1257_v55 = vld [vmem:[%s1954_s6 + $0x90] sm:$0xf0]  ;;  %v1236_v57 = vor.u32 %v1409_v48, %v1233_v50  ;;  %v1215_v58 = vld [vmem:[%s1954_s6 + $0x28] sm:$0xf]  ;;  %v1256_v61 = vor.u32 %v1418_v53, %v1255_v52 }
  0x46   : > { %v1407_v59 = vld [vmem:[%s1954_s6 + $0x34] sm:$0xf0]  ;;  %v1405_v60 = vld [vmem:[%s1954_s6 + $0x2c] sm:$0xf]  ;;  %v1217_v62 = vld [vmem:[%s1954_s6 + $0x38] sm:$0xf0]  ;;  %v1260_v63 = vor.u32 %v1416_v54, %v1257_v55 }
  0x47   : > { %615 = vmatpush.bf16.msra.mxu2 %v1264_v27  ;;  %v1239_v0 = vld [vmem:[%s1954_s6 + $0x60] sm:$0xf]  ;;  %v1414_v1 = vld [vmem:[%s1954_s6 + $0x6c] sm:$0xf0]  ;;  %v1412_v2 = vld [vmem:[%s1954_s6 + $0x64] sm:$0xf]  ;;  %v1216_v4 = vor.u32 %v1407_v59, %v1215_v58  ;;  %v1220_v5 = vor.u32 %v1405_v60, %v1217_v62 }
  0x48   : > { %634 = vmatpush.bf16.msra.mxu3 %v1268_v32  ;;  %v1241_v3 = vld [vmem:[%s1954_s6 + $0x70] sm:$0xf0]  ;;  %v1199_v6 = vld [vmem:[%s1954_s6 + $0x8] sm:$0xf]  ;;  %v1403_v7 = vld [vmem:[%s1954_s6 + $0x14] sm:$0xf0]  ;;  %v1240_v9 = vor.u32 %v1414_v1, %v1239_v0 }
  0x49   : > { %576 = vmatpush.bf16.msra.mxu0 %v1272_v49  ;;  %595 = vmatpush.bf16.msra.mxu1 %v1276_v51  ;;  %v1401_v8 = vld [vmem:[%s1954_s6 + $0xc] sm:$0xf]  ;;  %v1201_v10 = vld [vmem:[%s1954_s6 + $0x18] sm:$0xf0]  ;;  %v1244_v11 = vor.u32 %v1412_v2, %v1241_v3  ;;  %v1223_v12 = vld [vmem:[%s1954_s6 + $0x40] sm:$0xf]  ;;  %v1200_v16 = vor.u32 %v1403_v7, %v1199_v6 }
  0x4a   : > { %v1410_v13 = vld [vmem:[%s1954_s6 + $0x4c] sm:$0xf0]  ;;  %v1408_v14 = vld [vmem:[%s1954_s6 + $0x44] sm:$0xf]  ;;  %v1225_v15 = vld [vmem:[%s1954_s6 + $0x50] sm:$0xf0]  ;;  %v1204_v17 = vor.u32 %v1401_v8, %v1201_v10 }
  0x4b   : > { %616 = vmatpush.bf16.msra.mxu2 %v1248_v44  ;;  %v1224_v18 = vor.u32 %v1410_v13, %v1223_v12  ;;  %v1228_v19 = vor.u32 %v1408_v14, %v1225_v15  ;;  %v1207_v20 = vld [vmem:[%s1954_s6 + $0x20] sm:$0xf]  ;;  %v1406_v21 = vld [vmem:[%s1954_s6 + $0x2c] sm:$0xf0]  ;;  %v1404_v23 = vld [vmem:[%s1954_s6 + $0x24] sm:$0xf] }
  0x4c   : > { %635 = vmatpush.bf16.msra.mxu3 %v1252_v45  ;;  %v1398_v22 = vld [vmem:[#allocation2] sm:$0xff]  ;;  %v1208_v25 = vor.u32 %v1406_v21, %v1207_v20  ;;  %v1191_v27 = vld [vmem:[%s1954_s6] sm:$0xf]  ;;  %v1400_v29 = vld [vmem:[%s1954_s6 + $0x4] sm:$0xf] }
  0x4d   : > { %577 = vmatpush.bf16.msra.mxu0 %v1256_v61  ;;  %596 = vmatpush.bf16.msra.mxu1 %v1260_v63  ;;  %v1209_v24 = vld [vmem:[%s1954_s6 + $0x30] sm:$0xf0]  ;;  %v1402_v28 = vld [vmem:[%s1954_s6 + $0xc] sm:$0xf0]  ;;  %v1399_v33 = vld [vmem:[#allocation2 + $0x8] sm:$0xff] }
  0x4e   : > { %v1212_v26 = vor.u32 %v1404_v23, %v1209_v24  ;;  %v1193_v30 = vld [vmem:[%s1954_s6 + $0x10] sm:$0xf0]  ;;  %v1192_v31 = vor.u32 %v1402_v28, %v1191_v27  ;;  %v1439_v34 = vld [vmem:[%s1962_s27 + $0x38] sm:$0xff]  ;;  %v1438_v36 = vld [vmem:[%s1962_s27 + $0x30] sm:$0xff] }
  0x4f   : > { %617 = vmatpush.bf16.msra.mxu2 %v1232_v56  ;;  %v1196_v32 = vor.u32 %v1400_v29, %v1193_v30  ;;  %v1447_v35 = vld [vmem:[%s1962_s27 + $0x78] sm:$0xff]  ;;  %v1446_v37 = vld [vmem:[%s1962_s27 + $0x70] sm:$0xff]  ;;  %v1437_v39 = vld [vmem:[%s1962_s27 + $0x28] sm:$0xff] }
  0x50   : > { %636 = vmatpush.bf16.msra.mxu3 %v1236_v57  ;;  %v2037_v38 = vld [vmem:[%s1960_s14] sm:$0xf]  ;;  %v1445_v40 = vld [vmem:[%s1962_s27 + $0x68] sm:$0xff]  ;;  %v1436_v47 = vld [vmem:[%s1962_s27 + $0x20] sm:$0xff] }
  0x51   : > { %578 = vmatpush.bf16.msra.mxu0 %v1240_v9  ;;  %597 = vmatpush.bf16.msra.mxu1 %v1244_v11  ;;  %v2042_v41 = vperm.slane %v2037_v38, 2  ;;  %v2045_v42 = vperm.slane %v2037_v38, 3  ;;  %v1444_v48 = vld [vmem:[%s1962_s27 + $0x60] sm:$0xff]  ;;  %v1435_v51 = vld [vmem:[%s1962_s27 + $0x18] sm:$0xff]  ;;  %v1434_v57 = vld [vmem:[%s1962_s27 + $0x10] sm:$0xff] }
  0x52   : > { %v1443_v52 = vld [vmem:[%s1962_s27 + $0x58] sm:$0xff]  ;;  %v1442_v58 = vld [vmem:[%s1962_s27 + $0x50] sm:$0xff]  ;;  %v1433_v1 = vld [vmem:[%s1962_s27 + $0x8] sm:$0xff] }
  0x53   : > { %618 = vmatpush.bf16.msra.mxu2 %v1216_v4  ;;  %v1441_v2 = vld [vmem:[%s1962_s27 + $0x48] sm:$0xff]  ;;  %v1432_v7 = vld [vmem:[%s1962_s27] sm:$0xff] }
  0x54   : > { %637 = vmatpush.bf16.msra.mxu3 %v1220_v5  ;;  %v1440_v8 = vld [vmem:[%s1962_s27 + $0x40] sm:$0xff] }
  0x55   : > { %579 = vmatpush.bf16.msra.mxu0 %v1224_v18  ;;  %598 = vmatpush.bf16.msra.mxu1 %v1228_v19  ;;  %v2099_v18 = vperm.slane %v2037_v38, 0  ;;  %v2102_v19 = vperm.slane %v2037_v38, 1 }
  0x57   : > { %619 = vmatpush.bf16.msra.mxu2 %v1200_v16 }
  0x58   : > { %638 = vmatpush.bf16.msra.mxu3 %v1204_v17 }
  0x59   : > { %580 = vmatpush.bf16.msra.mxu0 %v1208_v25  ;;  %599 = vmatpush.bf16.msra.mxu1 %v1212_v26 }
  0x5a   : > { %620 = vmatmul.bf16.vlgmr.msra.gmra.mxu2 %v1398_v22 }
  0x5b   : > { %639 = vmatmul.bf16.vlgmr.msra.gmra.mxu3 %v1398_v22  ;;  %1448 = vmatpush.bf16.msrb.mxu2 %v1439_v34 }
  0x5c   : > { %1456 = vmatpush.bf16.msrb.mxu3 %v1447_v35 }
  0x5d   : > { %581 = vmatpush.bf16.msra.mxu0 %v1192_v31  ;;  %600 = vmatpush.bf16.msra.mxu1 %v1196_v32 }
  0x5f   : > { %1449 = vmatpush.bf16.msrb.mxu2 %v1438_v36 }
  0x60   : > { %582 = vmatmul.bf16.vlgmr.msra.gmra.mxu0 %v1398_v22  ;;  %601 = vmatmul.bf16.vlgmr.msra.gmra.mxu1 %v1398_v22 }
  0x61   : > { %950 = vmatpush.bf16.msrb.mxu0 %v1439_v34  ;;  %969 = vmatpush.bf16.msrb.mxu1 %v1447_v35 }
  0x62   : > { %1457 = vmatpush.bf16.msrb.mxu3 %v1446_v37 }
  0x63   : > { %1450 = vmatpush.bf16.msrb.mxu2 %v1437_v39 }
  0x65   : > { %951 = vmatpush.bf16.msrb.mxu0 %v1438_v36  ;;  %970 = vmatpush.bf16.msrb.mxu1 %v1446_v37 }
  0x66   : > { %1458 = vmatpush.bf16.msrb.mxu3 %v1445_v40 }
  0x67   : > { %1451 = vmatpush.bf16.msrb.mxu2 %v1436_v47 }
  0x69   : > { %952 = vmatpush.bf16.msrb.mxu0 %v1437_v39  ;;  %971 = vmatpush.bf16.msrb.mxu1 %v1445_v40 }
  0x6a   : > { %625 = vmatmul.bf16.gmra.mxu2 %v1399_v33  ;;  %1459 = vmatpush.bf16.msrb.mxu3 %v1444_v48 }
  0x6b   : > { %644 = vmatmul.bf16.gmra.mxu3 %v1399_v33  ;;  %1452 = vmatpush.bf16.msrb.mxu2 %v1435_v51 }
  0x6d   : > { %953 = vmatpush.bf16.msrb.mxu0 %v1436_v47  ;;  %972 = vmatpush.bf16.msrb.mxu1 %v1444_v48 }
  0x6e   : > { %1460 = vmatpush.bf16.msrb.mxu3 %v1443_v52 }
  0x6f   : > { %1453 = vmatpush.bf16.msrb.mxu2 %v1434_v57 }
  0x70   : > { %587 = vmatmul.bf16.gmra.mxu0 %v1399_v33  ;;  %606 = vmatmul.bf16.gmra.mxu1 %v1399_v33 }
  0x71   : > { %954 = vmatpush.bf16.msrb.mxu0 %v1435_v51  ;;  %973 = vmatpush.bf16.msrb.mxu1 %v1443_v52 }
  0x72   : > { %1461 = vmatpush.bf16.msrb.mxu3 %v1442_v58 }
  0x73   : > { %1454 = vmatpush.bf16.msrb.mxu2 %v1433_v1 }
  0x75   : > { %955 = vmatpush.bf16.msrb.mxu0 %v1434_v57  ;;  %974 = vmatpush.bf16.msrb.mxu1 %v1442_v58 }
  0x76   : > { %1462 = vmatpush.bf16.msrb.mxu3 %v1441_v2 }
  0x77   : > { %1455 = vmatpush.bf16.msrb.mxu2 %v1432_v7 }
  0x79   : > { %956 = vmatpush.bf16.msrb.mxu0 %v1433_v1  ;;  %975 = vmatpush.bf16.msrb.mxu1 %v1441_v2 }
  0x7a   : > { %1463 = vmatpush.bf16.msrb.mxu3 %v1440_v8 }
  0x7d   : > { %957 = vmatpush.bf16.msrb.mxu0 %v1432_v7  ;;  %976 = vmatpush.bf16.msrb.mxu1 %v1440_v8 }
  0xdd   : > { %v621_v43 = vpop.f32.mrf.mxu2  ;;  %v583_v26 = vpop.f32.mrf.mxu0 }
  0xde   : > { %v2048_v44 = vadd.f32 %v621_v43, %v2042_v41  ;;  %v640_v45 = vpop.f32.mrf.mxu3  ;;  %v602_v27 = vpop.f32.mrf.mxu1  ;;  %v2112_v30 = vadd.f32 %v583_v26, %v2099_v18 }
  0xdf   : > { %v2051_v46 = vadd.f32 %v640_v45, %v2045_v42  ;;  %v2115_v31 = vadd.f32 %v602_v27, %v2102_v19 }
  0xe0   : > { %v1317_v49 = vmul.f32 -1.442695, %v2048_v44 }
  0xe1   : > { %v1318_v50 = vmul.f32 -1.442695, %v2051_v46 }
  0xe2   : > { %1553 = vpow2.f32 %v1317_v49 }
  0xe3   : > { %1555 = vpow2.f32 %v1318_v50 }
  0xe5   : > { %v623_v53 = vpop.f32.mrf.mxu2 }
  0xe6   : > { %v2060_v54 = vadd.f32 %v623_v53, %v2042_v41  ;;  %v642_v55 = vpop.f32.mrf.mxu3 }
  0xe7   : > { %v2063_v56 = vadd.f32 %v642_v55, %v2045_v42 }
  0xe8   : > { %v1554_v59 = vpop.eup %1553  ;;  %v1319_v60 = vmul.f32 -1.442695, %v2060_v54 }
  0xe9   : > { %v1556_v61 = vpop.eup %1555  ;;  %v2068_v62 = vadd.f32 1.0, %v1554_v59  ;;  %v1320_v63 = vmul.f32 -1.442695, %v2063_v56 }
  0xea   : > { %v2071_v0 = vadd.f32 1.0, %v1556_v61  ;;  %1557 = vpow2.f32 %v1319_v60 }
  0xeb   : > { %1559 = vrcp.f32 %v2068_v62  ;;  %v691_v25 = vand.u32 2147483647, %v2068_v62  ;;  %v693_v28 = vand.u32 2147483648, %v2068_v62  ;;  %vm687_vm0 = vweird.f32 %v2068_v62 }
  0xec   : > { %1561 = vrcp.f32 %v2071_v0  ;;  %v706_v33 = vand.u32 2147483647, %v2071_v0  ;;  %v708_v34 = vand.u32 2147483648, %v2071_v0  ;;  %vm702_vm2 = vweird.f32 %v2071_v0 }
  0xed   : > { %1563 = vpow2.f32 %v1320_v63  ;;  %v626_v3 = vpop.f32.mrf.mxu2  ;;  %vm2128_vm3 = vcmp.eq.f32.partialorder %v691_v25, 8.507059e+37  ;;  %v694_v47 = vor.u32 1.1754944e-38, %v693_v28  ;;  %v604_v25 = vpop.f32.mrf.mxu1 }
  0xee   : > { %v2078_v4 = vadd.f32 %v626_v3, %v2042_v41  ;;  %v645_v5 = vpop.f32.mrf.mxu3  ;;  %vm2144_vm6 = vcmp.eq.f32.partialorder %v706_v33, 8.507059e+37  ;;  %v709_v53 = vor.u32 1.1754944e-38, %v708_v34  ;;  %v605_v34 = vadd.f32 %v604_v25, %v2102_v19 }
  0xef   : > { %v2081_v6 = vadd.f32 %v645_v5, %v2045_v42 }
  0xf0   : > { %v1558_v9 = vpop.eup %1557  ;;  %v1321_v10 = vmul.f32 -1.442695, %v2078_v4 }
  0xf1   : > { %v2086_v11 = vpop.eup %1559  ;;  %v2088_v12 = vadd.f32 1.0, %v1558_v9  ;;  %v1322_v13 = vmul.f32 -1.442695, %v2081_v6 }
  0xf2   : > { %v2091_v14 = vpop.eup %1561  ;;  %v683_v15 = vmul.f32 %v2086_v11, %v2068_v62  ;;  %1565 = vpow2.f32 %v1321_v10  ;;  %vm688_vm1 = vweird.f32 %v2086_v11 }
  0xf3   : > { %v1564_v16 = vpop.eup %1563  ;;  %v698_v17 = vmul.f32 %v2091_v14, %v2071_v0  ;;  %1567 = vrcp.f32 %v2088_v12  ;;  %vm703_vm4 = vweird.f32 %v2091_v14  ;;  %v723_v48 = vand.u32 2147483648, %v2088_v12  ;;  %vm2140_vm5 = vmor %vm687_vm0, %vm688_vm1 }
  0xf4   : > { %v684_v20 = vsub.f32 1.0, %v683_v15  ;;  %v2104_v21 = vadd.f32 1.0, %v1564_v16  ;;  %1569 = vpow2.f32 %v1322_v13  ;;  %vm717_vm7 = vweird.f32 %v2088_v12  ;;  %vm2156_vm8 = vmor %vm702_vm2, %vm703_vm4  ;;  %v585_v13 = vpop.f32.mrf.mxu0 }
  0xf5   : > { %v699_v22 = vsub.f32 1.0, %v698_v17  ;;  %v628_v23 = vpop.f32.mrf.mxu2  ;;  %v721_v59 = vand.u32 2147483647, %v2088_v12  ;;  %v724_v0 = vor.u32 1.1754944e-38, %v723_v48 }
  0xf6   : > { %v685_v24 = vmul.f32 %v2086_v11, %v684_v20  ;;  %1571 = vrcp.f32 %v2104_v21  ;;  %v2121_v35 = vadd.f32 %v628_v23, %v2042_v41  ;;  %v647_v43 = vpop.f32.mrf.mxu3  ;;  %v736_v3 = vand.u32 2147483647, %v2104_v21 }
  0xf7   : > { %v700_v29 = vmul.f32 %v2091_v14, %v699_v22  ;;  %v2163_v61 = vadd.f32 %v647_v43, %v2045_v42  ;;  %v738_v42 = vand.u32 2147483648, %v2104_v21  ;;  %vm722_vm12 = vcmp.eq.f32.partialorder %v721_v59, 8.507059e+37 }
  0xf8   : > { %v1566_v32 = vpop.eup %1565  ;;  %v686_v37 = vadd.f32 %v2086_v11, %v685_v24  ;;  %v1323_v49 = vmul.f32 -1.442695, %v2121_v35  ;;  %vm732_vm13 = vweird.f32 %v2104_v21  ;;  %v586_v24 = vadd.f32 %v585_v13, %v2099_v18 }
  0xf9   : > { %v1568_v36 = vpop.eup %1567  ;;  %v2126_v38 = vadd.f32 1.0, %v1566_v32  ;;  %v701_v40 = vadd.f32 %v2091_v14, %v700_v29  ;;  %v739_v23 = vor.u32 1.1754944e-38, %v738_v42  ;;  %vm737_vm15 = vcmp.eq.f32.partialorder %v736_v3, 8.507059e+37 }
  0xfa   : > { %v713_v41 = vmul.f32 %v1568_v36, %v2088_v12  ;;  %v1570_v45 = vpop.eup %1569  ;;  %v690_v57 = vsel %vm2140_vm5, %v2086_v11, %v686_v37  ;;  %vm718_vm9 = vweird.f32 %v1568_v36  ;;  %v1324_v11 = vmul.f32 -1.442695, %v2163_v61 }
  0xfb   : > { %1573 = vrcp.f32 %v2126_v38  ;;  %v705_v62 = vsel %vm2156_vm8, %v2091_v14, %v701_v40  ;;  %v2168_v1 = vadd.f32 1.0, %v1570_v45  ;;  %v695_v5 = vsel %vm2128_vm3, %v694_v47, %v690_v57  ;;  %vm719_vm10 = vmor %vm717_vm7, %vm718_vm9  ;;  %v607_v57 = vpop.f32.mrf.mxu1 }
  0xfc   : > { %v1572_v50 = vpop.eup %1571  ;;  %v714_v55 = vsub.f32 1.0, %v713_v41  ;;  %1575 = vpow2.f32 %v1323_v49  ;;  %v710_v9 = vsel %vm2144_vm6, %v709_v53, %v705_v62  ;;  %v802_v16 = vmul.f32 %v695_v5, %v2048_v44 }
  0xfd   : > { %v728_v60 = vmul.f32 %v1572_v50, %v2104_v21  ;;  %1577 = vrcp.f32 %v2168_v1  ;;  %vm733_vm11 = vweird.f32 %v1572_v50  ;;  %v803_v12 = vmul.f32 %v710_v9, %v2051_v46 }
  0xfe   : > { %v715_v63 = vmul.f32 %v1568_v36, %v714_v55  ;;  %1579 = vpow2.f32 %v1324_v11  ;;  %vm734_vm14 = vmor %vm732_vm13, %vm733_vm11  ;;  %v751_v49 = vand.u32 2147483647, %v2126_v38  ;;  %vm747_vm1 = vweird.f32 %v2126_v38 }
  0xff   : > { %v729_v2 = vsub.f32 1.0, %v728_v60  ;;  %v766_v53 = vand.u32 2147483647, %v2168_v1  ;;  %v768_v55 = vand.u32 2147483648, %v2168_v1  ;;  %vm762_vm5 = vweird.f32 %v2168_v1 }
 0x100   : > { %v716_v7 = vadd.f32 %v1568_v36, %v715_v63  ;;  %vm752_vm4 = vcmp.eq.f32.partialorder %v751_v49, 8.507059e+37 }
 0x101   : > { %v2175_v8 = vpop.eup %1573  ;;  %v730_v10 = vmul.f32 %v1572_v50, %v729_v2  ;;  %vm2220_vm8 = vcmp.eq.f32.partialorder %v766_v53, 8.507059e+37 }
 0x102   : > { %v720_v14 = vsel %vm719_vm10, %v1568_v36, %v716_v7  ;;  %v743_v15 = vmul.f32 %v2175_v8, %v2126_v38  ;;  %v1576_v26 = vpop.eup %1575  ;;  %v811_v36 = vmul.f32 %v803_v12, %v2115_v31  ;;  %vm748_vm0 = vweird.f32 %v2175_v8 }
 0x103   : > { %v725_v17 = vsel %vm722_vm12, %v724_v0, %v720_v14  ;;  %v731_v20 = vadd.f32 %v1572_v50, %v730_v10  ;;  %v2189_v28 = vpop.eup %1577  ;;  %v680_v44 = vadd.f32 1.0, %v1576_v26  ;;  %vm2204_vm2 = vmor %vm747_vm1, %vm748_vm0 }
 0x104   : > { %v804_v22 = vmul.f32 %v725_v17, %v2060_v54  ;;  %v744_v21 = vsub.f32 1.0, %v743_v15  ;;  %v758_v46 = vmul.f32 %v2189_v28, %v2168_v1  ;;  %v810_v54 = vmul.f32 %v802_v16, %v2112_v30  ;;  %v1580_v37 = vpop.eup %1579 }
 0x105   : > { %v735_v27 = vsel %vm734_vm14, %v1572_v50, %v731_v20  ;;  %1581 = vrcp.f32 %v680_v44  ;;  %v681_v45 = vadd.f32 1.0, %v1580_v37  ;;  %v753_v50 = vand.u32 2147483648, %v2126_v38 }
 0x106   : > { %v740_v29 = vsel %vm737_vm15, %v739_v23, %v735_v27  ;;  %v812_v32 = vmul.f32 %v804_v22, %v586_v24  ;;  %v745_v39 = vmul.f32 %v2175_v8, %v744_v21  ;;  %v759_v40 = vsub.f32 1.0, %v758_v46 }
 0x107   : > { %v805_v33 = vmul.f32 %v740_v29, %v2063_v56  ;;  %1583 = vrcp.f32 %v681_v45  ;;  %v588_v56 = vpop.f32.mrf.mxu0  ;;  %vm763_vm3 = vweird.f32 %v2189_v28  ;;  %v754_v62 = vor.u32 1.1754944e-38, %v753_v50 }
 0x108   : > { %v818_v43 = vpack.c.bf16 %v812_v32, %v810_v54  ;;  %v746_v48 = vadd.f32 %v2175_v8, %v745_v39  ;;  %v760_v30 = vmul.f32 %v2189_v28, %v759_v40  ;;  %v781_v63 = vand.u32 2147483647, %v680_v44  ;;  %vm2216_vm7 = vmor %vm762_vm5, %vm763_vm3 }
 0x109   : > { %v813_v41 = vmul.f32 %v805_v33, %v605_v34  ;;  %v783_v0 = vand.u32 2147483648, %v680_v44  ;;  %v589_v9 = vadd.f32 %v588_v56, %v2099_v18  ;;  %vm777_vm9 = vweird.f32 %v680_v44 }
 0x10a   : > { %958 = vmatmul.bf16.vlgmr.msrb.gmra.mxu0 %v818_v43  ;;  %v750_v58 = vsel %vm2204_vm2, %v2175_v8, %v746_v48  ;;  %v761_v59 = vadd.f32 %v2189_v28, %v760_v30  ;;  %v769_v8 = vor.u32 1.1754944e-38, %v768_v55  ;;  %vm782_vm11 = vcmp.eq.f32.partialorder %v781_v63, 8.507059e+37 }
 0x10b   : > { %v819_v47 = vpack.c.bf16 %v813_v41, %v811_v36  ;;  %v1582_v31 = vpop.eup %1581  ;;  %v755_v5 = vsel %vm752_vm4, %v754_v62, %v750_v58  ;;  %v784_v13 = vor.u32 1.1754944e-38, %v783_v0  ;;  %v796_v14 = vand.u32 2147483647, %v681_v45 }
 0x10c   : > { %v773_v51 = vmul.f32 %v1582_v31, %v680_v44  ;;  %vm778_vm6 = vweird.f32 %v1582_v31  ;;  %v765_v10 = vsel %vm2216_vm7, %v2189_v28, %v761_v59  ;;  %v798_v15 = vand.u32 2147483648, %v681_v45  ;;  %v609_v28 = vpop.f32.mrf.mxu1 }
 0x10d   : > { %977 = vmatmul.bf16.vlgmr.msrb.gmra.mxu1 %v819_v47  ;;  %v1584_v38 = vpop.eup %1583  ;;  %vm779_vm10 = vmor %vm777_vm9, %vm778_vm6  ;;  %v806_v17 = vmul.f32 %v755_v5, %v2078_v4  ;;  %v770_v22 = vsel %vm2220_vm8, %v769_v8, %v765_v10  ;;  %vm792_vm13 = vweird.f32 %v681_v45  ;;  %vm797_vm15 = vcmp.eq.f32.partialorder %v796_v14, 8.507059e+37 }
 0x10e   : > { %v774_v60 = vsub.f32 1.0, %v773_v51  ;;  %v788_v3 = vmul.f32 %v1584_v38, %v681_v45  ;;  %vm793_vm12 = vweird.f32 %v1584_v38  ;;  %v799_v27 = vor.u32 1.1754944e-38, %v798_v15 }
 0x10f   : > { %v590_v16 = vpop.f32.mrf.mxu0  ;;  %vm794_vm14 = vmor %vm792_vm13, %vm793_vm12  ;;  %v608_v21 = vadd.f32 %v607_v57, %v2102_v19  ;;  %v807_v4 = vmul.f32 %v770_v22, %v2081_v6  ;;  %v814_v44 = vmul.f32 %v806_v17, %v589_v9 }
 0x110   : > { %v775_v2 = vmul.f32 %v1582_v31, %v774_v60  ;;  %v789_v11 = vsub.f32 1.0, %v788_v3  ;;  %v591_v26 = vadd.f32 %v590_v16, %v2099_v18 }
 0x111   : > { %v815_v34 = vmul.f32 %v807_v4, %v608_v21 }
 0x112   : > { %v776_v1 = vadd.f32 %v1582_v31, %v775_v2  ;;  %v790_v12 = vmul.f32 %v1584_v38, %v789_v11 }
 0x114   : > { %v780_v20 = vsel %vm779_vm10, %v1582_v31, %v776_v1  ;;  %v791_v25 = vadd.f32 %v1584_v38, %v790_v12 }
 0x115   : > { %v785_v23 = vsel %vm782_vm11, %v784_v13, %v780_v20 }
 0x116   : > { %v808_v24 = vmul.f32 %v785_v23, %v2121_v35  ;;  %v795_v29 = vsel %vm794_vm14, %v1584_v38, %v791_v25  ;;  %v610_v35 = vadd.f32 %v609_v28, %v2102_v19 }
 0x117   : > { %v800_v33 = vsel %vm797_vm15, %v799_v27, %v795_v29 }
 0x118   : > { %v816_v32 = vmul.f32 %v808_v24, %v591_v26  ;;  %v809_v46 = vmul.f32 %v800_v33, %v2163_v61 }
 0x11a   : > { %v820_v54 = vpack.c.bf16 %v816_v32, %v814_v44  ;;  %v817_v36 = vmul.f32 %v809_v46, %v610_v35 }
 0x11c   : > { %963 = vmatmul.bf16.vlgmr.msrb.gmra.mxu2 %v820_v54  ;;  %v821_v18 = vpack.c.bf16 %v817_v36, %v815_v34 }
 0x11e   : > { %982 = vmatmul.bf16.vlgmr.msrb.gmra.mxu3 %v821_v18 }
 0x187   : > { %v959_v37 = vpop.f32.mrf.mxu0 }
 0x18a   : > { %v978_v39 = vpop.f32.mrf.mxu1 }
 0x18b   : > { %v979_v40 = vadd.f32 %v978_v39, %v959_v37 }
 0x18f   : > { %v961_v41 = vpop.f32.mrf.mxu0 }
 0x192   : > { %v980_v43 = vpop.f32.mrf.mxu1 }
 0x193   : > { %v981_v6 = vadd.f32 %v980_v43, %v961_v41 }
 0x19f   : > { %v964_v45 = vpop.f32.mrf.mxu2 }
 0x1a1   : > { %v983_v47 = vpop.f32.mrf.mxu3 }
 0x1a2   : > { %v984_v56 = vadd.f32 %v983_v47, %v964_v45 }
 0x1a6   : > { %991 = sbr.rel (%p1389_p1) target bundleno = 431 (0x1af), region = 60 }
 0x1a7   : > { %v966_v48 = vpop.f32.mrf.mxu2 }
 0x1a9   : > { %v985_v30 = vpop.f32.mrf.mxu3 }
 0x1aa   : > { %v986_v61 = vadd.f32 %v985_v30, %v966_v48 }
 0x1ab   : > { %992 = vst [vmem:[#allocation10] sm:$0xff] %v979_v40 }
 0x1ac   : > { %993 = vst [vmem:[#allocation10 + $0x8] sm:$0xff] %v981_v6 }
 0x1ad   : > { %994 = vst [vmem:[#allocation10 + $0x10] sm:$0xff] %v984_v56 }
 0x1ae   : > { %995 = vst [vmem:[#allocation10 + $0x18] sm:$0xff] %v986_v61 }
 0x1af PF: > { %p1390_p2 = scmp.le.s32.totalorder %s1788_s21, 0 }
 0x1b1   : > { %999 = sbr.rel (%p1390_p2) target bundleno = 445 (0x1bd), region = 64 }
 0x1b6   : > { %v1000_v19 = vld [vmem:[#allocation10] sm:$0xff]  ;;  %v1001_v31 = vld [vmem:[#allocation10 + $0x8] sm:$0xff]  ;;  %v1002_v49 = vld [vmem:[#allocation10 + $0x10] sm:$0xff] }
 0x1b7   : > { %v1004_v50 = vadd.f32 %v1000_v19, %v979_v40  ;;  %v1005_v51 = vadd.f32 %v1001_v31, %v981_v6  ;;  %v1006_v52 = vadd.f32 %v1002_v49, %v984_v56  ;;  %v1003_v53 = vld [vmem:[#allocation10 + $0x18] sm:$0xff] }
 0x1b8   : > { %v1007_v55 = vadd.f32 %v1003_v53, %v986_v61 }
 0x1b9   : > { %1008 = vst [vmem:[#allocation10] sm:$0xff] %v1004_v50 }
 0x1ba   : > { %1009 = vst [vmem:[#allocation10 + $0x8] sm:$0xff] %v1005_v51 }
 0x1bb   : > { %1010 = vst [vmem:[#allocation10 + $0x10] sm:$0xff] %v1006_v52 }
 0x1bc   : > { %1011 = vst [vmem:[#allocation10 + $0x18] sm:$0xff] %v1007_v55 }
 0x1bd PF: > { %p1391_p3 = scmp.ne.s32.totalorder %s1788_s21, 1 }
 0x1bf   : > { %1015 = sbr.rel (%p1391_p3) target bundleno = 459 (0x1cb), region = 68 }
 0x1c4   : > { %v1016_v57 = vld [vmem:[#allocation10] sm:$0xff]  ;;  %v1585_v58 = vld [vmem:[%s2269_s4] ss:$0 sm:$0xff]  ;;  %v1018_v60 = vld [vmem:[#allocation10 + $0x10] sm:$0xff] }
 0x1c5   : > { %v1017_v59 = vld [vmem:[#allocation10 + $0x8] sm:$0xff]  ;;  %v1019_v38 = vld [vmem:[#allocation10 + $0x18] sm:$0xff]  ;;  %v1024_v62 = vadd.f32 %v1585_v58, %v1016_v57  ;;  %v1026_v0 = vadd.f32 %v1585_v58, %v1018_v60 }
 0x1c6   : > { %v1025_v63 = vadd.f32 %v1585_v58, %v1017_v59  ;;  %v1027_v2 = vadd.f32 %v1585_v58, %v1019_v38 }
 0x1c7   : > { %1028 = vst [vmem:[#allocation10] sm:$0xff] %v1024_v62 }
 0x1c8   : > { %1029 = vst [vmem:[#allocation10 + $0x8] sm:$0xff] %v1025_v63 }
 0x1c9   : > { %1030 = vst [vmem:[#allocation10 + $0x10] sm:$0xff] %v1026_v0 }
 0x1ca   : > { %1031 = vst [vmem:[#allocation10 + $0x18] sm:$0xff] %v1027_v2 }
 0x1cb PF: > { %p1495_p4 = scmp.eq.s32.totalorder %s1906_s25, 1  ;;  %s1042_s12 = sshll.u32 %s2270_s5, 4  ;;  %s1043_s12 = int_to_ptr.hbm [resolvable:$true] %s1042_s12 }
 0x1cc   : > { %s1803_s13 = smov [#allocation10]   ;;  %s1804_s17 = smov 128  }
 0x1cd   : > { %s1040_s16 = sshll.u32 %s1803_s13, 4  ;;  %s1805_s28 = smov 8   ;;  %s1041_s16 = int_to_ptr.vmem [resolvable:$true] %s1040_s16 }
 0x1ce   : > { %1475 = dma.vmem_to_hbm [thread:$0]  (%p1495_p4), %s1041_s16, 512, %s1043_s12, [#allocation4], %s1804_s17, %s1804_s17, %s1805_s28  }
 0x1cf   : > { %1771 = dma.done.wait (%p1495_p4), [#allocation4], 512  }
 0x1d0   : > { %1773 = vsyncadd (%p1495_p4), [#allocation4], 4294966784 }
 0x1d1 PF: > { %s2300_s30 = sld [smem:[#allocation16_spill]]  ;;  %s2304_s18 = smov %s1780_s19 }
 0x1d2   : > { %s2301_s7 = sld [smem:[#allocation15_spill]]  ;;  %s2306_s21 = smov %s1792_s22 }
 0x1d3   : > { %s2302_s20 = sld [smem:[#allocation18_spill]] }
 0x1d4   : > { %s2303_s25 = sld [smem:[#allocation17_spill]] }
 0x1d7   : > { %s23_s23 = sadd.s32 1, %s2300_s30  }
 0x1d8   : > { %p20_p5 = scmp.ge.s32.totalorder %s23_s23, 4   ;;  %s2305_s19 = smov %s2301_s7 }
 0x1da   : > { %s2307_s22 = smov %s2303_s25  ;;  %22 = sbr.rel (!%p20_p5) target bundleno = 11 (0xb), region = 120 }
 0x1df   :  { %1059 = vsyncpa [#allocation3], 1 }
 0x1e0   :  { %1061 = vsyncpa [#allocation3 + $0x1], 1 }
 0x1e1   :  { %1062 = vsyncpa [#allocation6], 1 }
 0x1e2   :  { %1064 = vsyncpa [#allocation6 + $0x1], 1 }
 0x1e3   :  { %1065 = vsyncpa [#allocation9], 1 }
 0x1e4   :  { %1067 = vsyncpa [#allocation9 + $0x1], 1 }
 0x1e5   :  { %1068 = vsyncpa [#allocation4], 1 }
 0x1e6   :  { %1070 = vsyncpa [#allocation4 + $0x1], 1 }

</bundles_post_ra>
